<compile_context>
chip_gen: v7x
topology: tpu7x:2x2x1
jax: 0.10.0
libtpu: 0.0.40
codegen_flags: <defaults>
</compile_context>

<pallas_src>
import functools

import jax
import jax.numpy as jnp
from jax import lax
from jax.experimental import pallas as pl
from jax.experimental.pallas import tpu as pltpu

_INV_SQRT2 = 0.7071067811865476


def _round_up(n, m):
    return ((n + m - 1) // m) * m


def _gelu(v, approximate):
    if approximate:
        # tanh-approximate GELU: transcendental goes to the EUP slot.
        return jax.nn.gelu(v, approximate=True)
    # exact erf GELU (nn.GELU() default semantics), VALU polynomial.
    return 0.5 * v * (1.0 + lax.erf(v * _INV_SQRT2))


def _make_kernel(approximate_gelu):
    def mlp_kernel(x_ref, w1_ref, b1_ref, w2_ref, b2_ref, w3_ref, b3_ref, o_ref):
        # Layer 1: Linear (bf16 operands, f32 accum) + GELU
        h1 = jnp.dot(x_ref[...], w1_ref[...], preferred_element_type=jnp.float32)
        h1 = _gelu(h1 + b1_ref[...], approximate_gelu).astype(jnp.bfloat16)
        # Layer 2: Linear + GELU
        h2 = jnp.dot(h1, w2_ref[...], preferred_element_type=jnp.float32)
        h2 = _gelu(h2 + b2_ref[...], approximate_gelu).astype(jnp.bfloat16)
        # Layer 3: Linear (Identity activation), lane-dense padded bf16 output
        out = jnp.dot(h2, w3_ref[...], preferred_element_type=jnp.float32) + b3_ref[...]
        o_ref[...] = out.astype(o_ref.dtype)

    return mlp_kernel


def prepare_mlp_params(w1, b1, w2, b2, w3, b3):
    """One-time weight preparation (bf16 cast + lane padding of the last layer).

    Hoisted out of the per-call forward so no pad/convert XLA kernels run on
    every forward pass."""
    H2, N = w3.shape
    Np = _round_up(N, 128)
    w1b = jnp.asarray(w1, jnp.bfloat16)
    w2b = jnp.asarray(w2, jnp.bfloat16)
    w3p = jnp.zeros((H2, Np), jnp.bfloat16).at[:, :N].set(jnp.asarray(w3, jnp.bfloat16))
    b1f = jnp.asarray(b1, jnp.float32).reshape(1, -1)
    b2f = jnp.asarray(b2, jnp.float32).reshape(1, -1)
    b3p = (
        jnp.zeros((1, Np), jnp.float32)
        .at[:, :N]
        .set(jnp.asarray(b3, jnp.float32).reshape(1, -1))
    )
    return w1b, b1f, w2b, b2f, w3p, b3p


def _choose_tm(B, block_m):
    Bp8 = _round_up(B, 8)
    tm = min(block_m, Bp8)
    # Keep >=2 grid steps for large batches so the "parallel" batch axis can be
    # split across v7x's two TensorCores (irrelevant for small B).
    if tm == Bp8 and Bp8 >= 1024:
        tm = _round_up((Bp8 + 1) // 2, 8)
    return tm


@functools.partial(
    jax.jit, static_argnames=("out_feat", "block_m", "approximate_gelu")
)
def mlp_forward(x, w1b, b1f, w2b, b2f, w3p, b3p, *, out_feat, block_m=512,
                approximate_gelu=True):
    B, K = x.shape
    H1 = w1b.shape[1]
    H2 = w2b.shape[1]
    Np = w3p.shape[1]
    N = out_feat

    tm = _choose_tm(B, block_m)
    Bp = _round_up(B, tm)

    # Only x is cast (and batch-padded if needed) per call; no K padding.
    if Bp != B:
        xb = jnp.zeros((Bp, K), jnp.bfloat16).at[:B, :].set(x.astype(jnp.bfloat16))
    else:
        xb = x.astype(jnp.bfloat16)

    grid = (Bp // tm,)

    flops = 2 * Bp * (K * H1 + H1 * H2 + H2 * Np)
    transcendentals = Bp * (H1 + H2)
    bytes_accessed = (
        Bp * K * 2                              # x (bf16)
        + (K * H1 + H1 * H2 + H2 * Np) * 2      # weights (bf16)
        + (H1 + H2 + Np) * 4                    # biases (f32)
        + Bp * Np * 2                           # output (bf16)
    )

    # Weight/bias blocks have a constant block index -> stay VMEM-resident
    # across all batch tiles (only the x tile and output tile are pipelined).
    resident = lambda shape: pl.BlockSpec(shape, lambda i: (0,) * len(shape))

    out_padded = pl.pallas_call(
        _make_kernel(approximate_gelu),
        out_shape=jax.ShapeDtypeStruct((Bp, Np), jnp.bfloat16),
        grid=grid,
        in_specs=[
            pl.BlockSpec((tm, K), lambda i: (i, 0)),    # x tile, pipelined
            resident((K, H1)), resident((1, H1)),       # W1, b1
            resident((H1, H2)), resident((1, H2)),      # W2, b2
            resident((H2, Np)), resident((1, Np)),      # W3, b3
        ],
        out_specs=pl.BlockSpec((tm, Np), lambda i: (i, 0)),
        compiler_params=pltpu.CompilerParams(
            dimension_semantics=("parallel",),
        ),
        cost_estimate=pl.CostEstimate(
            flops=flops,
            transcendentals=transcendentals,
            bytes_accessed=bytes_accessed,
        ),
    )(xb, w1b, b1f, w2b, b2f, w3p, b3p)

    # Slice away batch / output-feature padding and restore f32 outside.
    return out_padded[:B, :N].astype(jnp.float32)


def init_mlp_params(key, input_dim, hidden=(256, 256), out_feat=10):
    """Deterministic init mimicking nn.Linear shapes.

    PyTorch stores weight as (out, in); we store the transpose (in, out)."""
    ch = [input_dim] + list(hidden) + [out_feat]
    params = []
    for i in range(len(ch) - 1):
        key, kw, kb = jax.random.split(key, 3)
        fan_in = ch[i]
        bound = 1.0 / jnp.sqrt(fan_in)
        w = jax.random.uniform(kw, (ch[i], ch[i + 1]), jnp.float32, -bound, bound)
        b = jax.random.uniform(kb, (1, ch[i + 1]), jnp.float32, -bound, bound)
        params += [w, b]
    return params


def mlp_reference(x, w1, b1, w2, b2, w3, b3, approximate_gelu=True):
    # Reference applies the same bf16 operand quantization, GELU variant and
    # final bf16 output store as the kernel, so the comparison isolates Pallas
    # kernel correctness (accumulation stays f32 in both).
    def lin(a, w, b):
        af = a.astype(jnp.bfloat16).astype(jnp.float32)
        wf = w.astype(jnp.bfloat16).astype(jnp.float32)
        return jnp.dot(af, wf, preferred_element_type=jnp.float32) + b

    h = _gelu(lin(x, w1, b1), approximate_gelu)
    h = _gelu(lin(h, w2, b2), approximate_gelu)
    out = lin(h, w3, b3)
    return out.astype(jnp.bfloat16).astype(jnp.float32)


if __name__ == "__main__":
    key = jax.random.PRNGKey(0)
    key, kx = jax.random.split(key)

    batch, input_dim, out_feat = 8, 32, 10
    x = jax.random.normal(kx, (batch, input_dim), jnp.float32)

    w1, b1, w2, b2, w3, b3 = init_mlp_params(
        key, input_dim, hidden=(256, 256), out_feat=out_feat
    )

    # One-time weight prep (bf16 cast + padding) hoisted out of the forward.
    prepped = prepare_mlp_params(w1, b1, w2, b2, w3, b3)

    out = mlp_forward(x, *prepped, out_feat=out_feat)
    out = jax.block_until_ready(out)

    ref = mlp_reference(x, w1, b1, w2, b2, w3, b3)
    assert out.shape == (batch, out_feat)
    assert jnp.allclose(out, ref, atol=5e-3, rtol=5e-3), "mismatch vs reference"

    print("KERNEL_OK")
</pallas_src>

<mosaic_0001>
module attributes {stable_mosaic.version = 11 : i64} {
  func.func @mlp_kernel(%arg0: i32, %arg1: memref<8x32xbf16, #tpu.memory_space<vmem>>, %arg2: memref<32x256xbf16, #tpu.memory_space<vmem>>, %arg3: memref<1x256xf32, #tpu.memory_space<vmem>>, %arg4: memref<256x256xbf16, #tpu.memory_space<vmem>>, %arg5: memref<1x256xf32, #tpu.memory_space<vmem>>, %arg6: memref<256x128xbf16, #tpu.memory_space<vmem>>, %arg7: memref<1x128xf32, #tpu.memory_space<vmem>>, %arg8: memref<8x128xbf16, #tpu.memory_space<vmem>>) attributes {dimension_semantics = [#tpu.dimension_semantics<parallel>], iteration_bounds = array<i64: 1>, scalar_prefetch = 0 : i64, scratch_operands = 0 : i64, tpu.core_type = #tpu.core_type<tc>, window_params = [{transform_indices = @transform_0, window_bounds = array<i64: 8, 32>}, {pipeline_mode = #tpu.pipeline_mode<synchronous>, transform_indices = @transform_1, window_bounds = array<i64: 32, 256>}, {pipeline_mode = #tpu.pipeline_mode<synchronous>, transform_indices = @transform_2, window_bounds = array<i64: 1, 256>}, {pipeline_mode = #tpu.pipeline_mode<synchronous>, transform_indices = @transform_3, window_bounds = array<i64: 256, 256>}, {pipeline_mode = #tpu.pipeline_mode<synchronous>, transform_indices = @transform_4, window_bounds = array<i64: 1, 256>}, {pipeline_mode = #tpu.pipeline_mode<synchronous>, transform_indices = @transform_5, window_bounds = array<i64: 256, 128>}, {pipeline_mode = #tpu.pipeline_mode<synchronous>, transform_indices = @transform_6, window_bounds = array<i64: 1, 128>}, {transform_indices = @transform_7, window_bounds = array<i64: 8, 128>}]} {
    %c0 = arith.constant 0 : index
    %c0_0 = arith.constant 0 : index
    %0 = vector.load %arg1[%c0, %c0_0] : memref<8x32xbf16, #tpu.memory_space<vmem>>, vector<8x32xbf16>
    %c0_1 = arith.constant 0 : index
    %c0_2 = arith.constant 0 : index
    %1 = vector.load %arg2[%c0_1, %c0_2] : memref<32x256xbf16, #tpu.memory_space<vmem>>, vector<32x256xbf16>
    %cst = arith.constant dense<0.000000e+00> : vector<8x256xf32>
    %2 = tpu.matmul %0, %1, %cst {dimension_numbers = #tpu.dot_dimension_numbers<[1], [0], [0], [1], [0, 0, 1, 1], [], []>} : vector<8x32xbf16>, vector<32x256xbf16>, vector<8x256xf32> -> vector<8x256xf32>
    %c0_3 = arith.constant 0 : index
    %c0_4 = arith.constant 0 : index
    %3 = vector.load %arg3[%c0_3, %c0_4] : memref<1x256xf32, #tpu.memory_space<vmem>>, vector<1x256xf32>
    %4 = vector.broadcast %3 : vector<1x256xf32> to vector<8x256xf32>
    %5 = arith.addf %2, %4 : vector<8x256xf32>
    %6 = arith.mulf %5, %5 : vector<8x256xf32>
    %7 = arith.mulf %5, %6 : vector<8x256xf32>
    %cst_5 = arith.constant 4.471500e-02 : f32
    %8 = vector.broadcast %cst_5 : f32 to vector<8x256xf32>
    %9 = arith.mulf %8, %7 : vector<8x256xf32>
    %10 = arith.addf %5, %9 : vector<8x256xf32>
    %cst_6 = arith.constant 0.797884583 : f32
    %11 = vector.broadcast %cst_6 : f32 to vector<8x256xf32>
    %12 = arith.mulf %11, %10 : vector<8x256xf32>
    %13 = math.tanh %12 : vector<8x256xf32>
    %cst_7 = arith.constant 1.000000e+00 : f32
    %14 = vector.broadcast %cst_7 : f32 to vector<8x256xf32>
    %15 = arith.addf %14, %13 : vector<8x256xf32>
    %cst_8 = arith.constant 5.000000e-01 : f32
    %16 = vector.broadcast %cst_8 : f32 to vector<8x256xf32>
    %17 = arith.mulf %16, %15 : vector<8x256xf32>
    %18 = arith.mulf %5, %17 : vector<8x256xf32>
    %19 = arith.truncf %18 : vector<8x256xf32> to vector<8x256xbf16>
    %c0_9 = arith.constant 0 : index
    %c0_10 = arith.constant 0 : index
    %20 = vector.load %arg4[%c0_9, %c0_10] : memref<256x256xbf16, #tpu.memory_space<vmem>>, vector<256x256xbf16>
    %cst_11 = arith.constant dense<0.000000e+00> : vector<8x256xf32>
    %21 = tpu.matmul %19, %20, %cst_11 {dimension_numbers = #tpu.dot_dimension_numbers<[1], [0], [0], [1], [0, 0, 1, 1], [], []>} : vector<8x256xbf16>, vector<256x256xbf16>, vector<8x256xf32> -> vector<8x256xf32>
    %c0_12 = arith.constant 0 : index
    %c0_13 = arith.constant 0 : index
    %22 = vector.load %arg5[%c0_12, %c0_13] : memref<1x256xf32, #tpu.memory_space<vmem>>, vector<1x256xf32>
    %23 = vector.broadcast %22 : vector<1x256xf32> to vector<8x256xf32>
    %24 = arith.addf %21, %23 : vector<8x256xf32>
    %25 = arith.mulf %24, %24 : vector<8x256xf32>
    %26 = arith.mulf %24, %25 : vector<8x256xf32>
    %cst_14 = arith.constant 4.471500e-02 : f32
    %27 = vector.broadcast %cst_14 : f32 to vector<8x256xf32>
    %28 = arith.mulf %27, %26 : vector<8x256xf32>
    %29 = arith.addf %24, %28 : vector<8x256xf32>
    %cst_15 = arith.constant 0.797884583 : f32
    %30 = vector.broadcast %cst_15 : f32 to vector<8x256xf32>
    %31 = arith.mulf %30, %29 : vector<8x256xf32>
    %32 = math.tanh %31 : vector<8x256xf32>
    %cst_16 = arith.constant 1.000000e+00 : f32
    %33 = vector.broadcast %cst_16 : f32 to vector<8x256xf32>
    %34 = arith.addf %33, %32 : vector<8x256xf32>
    %cst_17 = arith.constant 5.000000e-01 : f32
    %35 = vector.broadcast %cst_17 : f32 to vector<8x256xf32>
    %36 = arith.mulf %35, %34 : vector<8x256xf32>
    %37 = arith.mulf %24, %36 : vector<8x256xf32>
    %38 = arith.truncf %37 : vector<8x256xf32> to vector<8x256xbf16>
    %c0_18 = arith.constant 0 : index
    %c0_19 = arith.constant 0 : index
    %39 = vector.load %arg6[%c0_18, %c0_19] : memref<256x128xbf16, #tpu.memory_space<vmem>>, vector<256x128xbf16>
    %cst_20 = arith.constant dense<0.000000e+00> : vector<8x128xf32>
    %40 = tpu.matmul %38, %39, %cst_20 {dimension_numbers = #tpu.dot_dimension_numbers<[1], [0], [0], [1], [0, 0, 1, 1], [], []>} : vector<8x256xbf16>, vector<256x128xbf16>, vector<8x128xf32> -> vector<8x128xf32>
    %c0_21 = arith.constant 0 : index
    %c0_22 = arith.constant 0 : index
    %41 = vector.load %arg7[%c0_21, %c0_22] : memref<1x128xf32, #tpu.memory_space<vmem>>, vector<1x128xf32>
    %42 = vector.broadcast %41 : vector<1x128xf32> to vector<8x128xf32>
    %43 = arith.addf %40, %42 : vector<8x128xf32>
    %44 = arith.truncf %43 : vector<8x128xf32> to vector<8x128xbf16>
    %c0_23 = arith.constant 0 : index
    %c0_24 = arith.constant 0 : index
    %45 = vector.load %arg8[%c0_23, %c0_24] : memref<8x128xbf16, #tpu.memory_space<vmem>>, vector<8x128xbf16>
    tpu.vector_store %arg8[%c0_23, %c0_24], %44 {strides = array<i32>} : memref<8x128xbf16, #tpu.memory_space<vmem>>, vector<8x128xbf16>,
    return
  }
  func.func @transform_0(%arg0: i32) -> (i32, i32) {
    %c0_i32 = arith.constant 0 : i32
    %c0_i32_0 = arith.constant 0 : i32
    return %arg0, %c0_i32 : i32, i32
  }
  func.func @transform_1(%arg0: i32) -> (i32, i32) {
    %c0_i32 = arith.constant 0 : i32
    %c0_i32_0 = arith.constant 0 : i32
    %c0_i32_1 = arith.constant 0 : i32
    return %c0_i32, %c0_i32_0 : i32, i32
  }
  func.func @transform_2(%arg0: i32) -> (i32, i32) {
    %c0_i32 = arith.constant 0 : i32
    %c0_i32_0 = arith.constant 0 : i32
    %c0_i32_1 = arith.constant 0 : i32
    return %c0_i32, %c0_i32_0 : i32, i32
  }
  func.func @transform_3(%arg0: i32) -> (i32, i32) {
    %c0_i32 = arith.constant 0 : i32
    %c0_i32_0 = arith.constant 0 : i32
    %c0_i32_1 = arith.constant 0 : i32
    return %c0_i32, %c0_i32_0 : i32, i32
  }
  func.func @transform_4(%arg0: i32) -> (i32, i32) {
    %c0_i32 = arith.constant 0 : i32
    %c0_i32_0 = arith.constant 0 : i32
    %c0_i32_1 = arith.constant 0 : i32
    return %c0_i32, %c0_i32_0 : i32, i32
  }
  func.func @transform_5(%arg0: i32) -> (i32, i32) {
    %c0_i32 = arith.constant 0 : i32
    %c0_i32_0 = arith.constant 0 : i32
    %c0_i32_1 = arith.constant 0 : i32
    return %c0_i32, %c0_i32_0 : i32, i32
  }
  func.func @transform_6(%arg0: i32) -> (i32, i32) {
    %c0_i32 = arith.constant 0 : i32
    %c0_i32_0 = arith.constant 0 : i32
    %c0_i32_1 = arith.constant 0 : i32
    return %c0_i32, %c0_i32_0 : i32, i32
  }
  func.func @transform_7(%arg0: i32) -> (i32, i32) {
    %c0_i32 = arith.constant 0 : i32
    %c0_i32_0 = arith.constant 0 : i32
    return %arg0, %c0_i32 : i32, i32
  }
}

</mosaic_0001>

<bundles_post_ra>
// kernel: mlp_forward.1
= control target key start
LH: loop header
LB: loop body
LE: loop exit
PB: predicated region body
PF: predicated region fallthrough
CT: control target
= control target key end

     0   :  { %12 = vsyncpa [#allocation3], 0  ;;  %s968_s0 = inlined_call_operand.vmem [shape: bf16[8,32], index: 0, kind: input, shape index: {}]   ;;  %s969_s1 = inlined_call_operand.hbm [shape: bf16[32,256], index: 1, kind: input, shape index: {}]   ;;  %s970_s2 = inlined_call_operand.vmem [shape: f32[1,256], index: 2, kind: input, shape index: {}]   ;;  %s971_s3 = inlined_call_operand.hbm [shape: bf16[256,256], index: 3, kind: input, shape index: {}]   ;;  %s972_s4 = inlined_call_operand.vmem [shape: f32[1,256], index: 4, kind: input, shape index: {}]   ;;  %s973_s5 = inlined_call_operand.hbm [shape: bf16[256,128], index: 5, kind: input, shape index: {}]   ;;  %s974_s6 = inlined_call_operand.vmem [shape: f32[1,128], index: 6, kind: input, shape index: {}]   ;;  %s975_s7 = inlined_call_operand.vmem [shape: bf16[8,128], index: 7, kind: output, shape index: {}]  }
   0x1   :  { %13 = vsyncpa [#allocation5], 0  ;;  %s850_s24 = smov [#allocation4]   ;;  %s851_s26 = smov [#allocation2]  }
   0x2   :  { %s35_s25 = sshll.u32 %s850_s24, 4  ;;  %s21_s27 = sshll.u32 %s851_s26, 4  ;;  %s36_s25 = int_to_ptr.vmem [resolvable:$true] %s35_s25  ;;  %s898_s27 = int_to_ptr.vmem [resolvable:$true] %s21_s27 }
   0x3   :  { %s780_s30 = scalar_lea.hbm %s971_s3, 4096 }
   0x4   :  { %p781_p0 = scmp.ne.s32.totalorder %s971_s3, %s780_s30  ;;  %p784_p1 = scmp.lt.u32.totalorder %s780_s30, %s971_s3 }
   0x6   :  { %p786_p2 = pnand %p784_p1, %p781_p0 }
   0x8   :  { %789 = shalt.err (!%p786_p2)
}
   0x9   :  { %s790_s12 = scalar_lea.vmem %s36_s25, 4096  ;;  %p795_p4 = scmp.lt.s32.totalorder %s36_s25, %s36_s25 }
   0xa   :  { %p791_p3 = scmp.ne.s32.totalorder %s36_s25, %s790_s12  ;;  %p796_p5 = scmp.lt.s32.totalorder %s790_s12, %s790_s12 }
   0xc   :  { %p797_p6 = por %p796_p5, %p795_p4 }
   0xe   :  { %p798_p7 = pnand %p797_p6, %p791_p3 }
  0x10   :  { %801 = shalt.err (!%p798_p7)
}
  0x11   :  { %s852_s13 = smov 128   ;;  %s853_s14 = smov 8  }
  0x12   :  { %41 = dma.hbm_to_vmem [thread:$0]  %s971_s3, 4096, %s36_s25, [#allocation5], %s852_s13, %s852_s13, %s853_s14  }
  0x13   :  { %s802_s19 = scalar_lea.hbm %s969_s1, 512 }
  0x14   :  { %p803_p8 = scmp.ne.s32.totalorder %s969_s1, %s802_s19  ;;  %p806_p9 = scmp.lt.u32.totalorder %s802_s19, %s969_s1 }
  0x16   :  { %p808_p10 = pnand %p806_p9, %p803_p8 }
  0x18   :  { %811 = shalt.err (!%p808_p10)
}
  0x19   :  { %s812_s24 = scalar_lea.vmem %s898_s27, 512  ;;  %p817_p12 = scmp.lt.s32.totalorder %s898_s27, %s898_s27 }
  0x1a   :  { %p813_p11 = scmp.ne.s32.totalorder %s898_s27, %s812_s24  ;;  %p818_p13 = scmp.lt.s32.totalorder %s812_s24, %s812_s24 }
  0x1c   :  { %p819_p0 = por %p818_p13, %p817_p12 }
  0x1e   :  { %p820_p1 = pnand %p819_p0, %p813_p11 }
  0x20   :  { %823 = shalt.err (!%p820_p1)
}
  0x21   :  { %27 = dma.hbm_to_vmem [thread:$0]  %s969_s1, 512, %s898_s27, [#allocation3], %s852_s13, %s852_s13, %s853_s14  }
  0x22   :  { %s854_s26 = smov [#allocation6]   ;;  %s824_s8 = scalar_lea.hbm %s973_s5, 2048 }
  0x23   :  { %s49_s28 = sshll.u32 %s854_s26, 4  ;;  %p825_p2 = scmp.ne.s32.totalorder %s973_s5, %s824_s8  ;;  %s50_s28 = int_to_ptr.vmem [resolvable:$true] %s49_s28 }
  0x24   :  { %p828_p3 = scmp.lt.u32.totalorder %s824_s8, %s973_s5 }
  0x26   :  { %p830_p4 = pnand %p828_p3, %p825_p2 }
  0x28   :  { %833 = shalt.err (!%p830_p4)
}
  0x29   :  { %s834_s15 = scalar_lea.vmem %s50_s28, 2048  ;;  %p839_p6 = scmp.lt.s32.totalorder %s50_s28, %s50_s28 }
  0x2a   :  { %p835_p5 = scmp.ne.s32.totalorder %s50_s28, %s834_s15  ;;  %p840_p7 = scmp.lt.s32.totalorder %s834_s15, %s834_s15 }
  0x2c   :  { %p841_p8 = por %p840_p7, %p839_p6 }
  0x2e   :  { %p842_p9 = pnand %p841_p8, %p835_p5 }
  0x30   :  { %845 = shalt.err (!%p842_p9)
}
  0x31   :  { %s855_s1 = smov 64   ;;  %s856_s27 = smov 4  }
  0x32   :  { %55 = dma.hbm_to_vmem [thread:$0]  %s973_s5, 2048, %s50_s28, [#allocation5], %s855_s1, %s855_s1, %s856_s27  }
  0x33   :  { %846 = dma.done.wait [#allocation3], 512  }
  0x34   :  { %847 = vsyncadd [#allocation3], 4294966784 }
  0x35   :  { %848 = dma.done.wait [#allocation5], 6144  }
  0x36   :  { %849 = vsyncadd [#allocation5], 4294961152  ;;  %v857_v0 = vmov 0   ;;  %v702_v1 = vld [vmem:[#allocation2 + $0x4] ss:$8 sps:$4 sm:$0xff]   ;;  %vm105_vm0 = vcmask 261120   ;;  %v75_v38 = vlaneseq }
  0x37   :  { %141 = vmatprep.mubr.bf16.mxu0 %v857_v0  ;;  %v704_v2 = vld [vmem:[#allocation2] ss:$8 sps:$4 sm:$0xff]   ;;  %109 = vmatprep.subr.bf16.mxu0 %v702_v1  ;;  %v705_v3 = vld [vmem:[#allocation2 + $0x14] ss:$8 sps:$4 sm:$0xff]   ;;  %v707_v4 = vld [vmem:[#allocation2 + $0x10] ss:$8 sps:$4 sm:$0xff]  }
  0x38   :  { %110 = vmatpush1.bf16.msra.mxu0 %v704_v2  ;;  %v708_v5 = vld [vmem:[#allocation4 + $0x4] ss:$8 sps:$4 sm:$0xff]   ;;  %v710_v6 = vld [vmem:[#allocation4] ss:$8 sps:$4 sm:$0xff]   ;;  %v711_v7 = vld [vmem:[#allocation4 + $0x14] ss:$8 sps:$4 sm:$0xff]  }
  0x39   :  { %111 = vmatprep.subr.bf16.mxu0 %v705_v3  ;;  %374 = vmatprep.subr.bf16.mxu1 %v708_v5  ;;  %v68_v8 = vld [vmem:[%s968_s0] sm:$0xf]  ;;  %v713_v9 = vld [vmem:[#allocation4 + $0x10] ss:$8 sps:$4 sm:$0xff]   ;;  %v714_v10 = vld [vmem:[#allocation4 + $0x24] ss:$8 sps:$4 sm:$0xff]  }
  0x3a   :  { %375 = vmatpush1.bf16.msra.mxu1 %v710_v6  ;;  %v716_v11 = vld [vmem:[#allocation4 + $0x20] ss:$8 sps:$4 sm:$0xff]   ;;  %v717_v12 = vld [vmem:[#allocation4 + $0x34] ss:$8 sps:$4 sm:$0xff]   ;;  %v719_v13 = vld [vmem:[#allocation4 + $0x30] ss:$8 sps:$4 sm:$0xff]  }
  0x3b   :  { %376 = vmatprep.subr.bf16.mxu1 %v711_v7  ;;  %v720_v14 = vld [vmem:[#allocation4 + $0x44] ss:$8 sps:$4 sm:$0xff]   ;;  %v722_v15 = vld [vmem:[#allocation4 + $0x40] ss:$8 sps:$4 sm:$0xff]   ;;  %v723_v16 = vld [vmem:[#allocation4 + $0x54] ss:$8 sps:$4 sm:$0xff]  }
  0x3c   :  { %112 = vmatpush1.bf16.msra.mxu0 %v707_v4  ;;  %v725_v17 = vld [vmem:[#allocation4 + $0x50] ss:$8 sps:$4 sm:$0xff]   ;;  %v726_v18 = vld [vmem:[#allocation4 + $0x64] ss:$8 sps:$4 sm:$0xff]   ;;  %v728_v19 = vld [vmem:[#allocation4 + $0x60] ss:$8 sps:$4 sm:$0xff]  }
  0x3d   :  { %v729_v20 = vld [vmem:[#allocation4 + $0x74] ss:$8 sps:$4 sm:$0xff]   ;;  %v731_v21 = vld [vmem:[#allocation4 + $0x70] ss:$8 sps:$4 sm:$0xff]   ;;  %v732_v22 = vld [vmem:[#allocation4 + $0x84] ss:$8 sps:$4 sm:$0xff]  }
  0x3e   :  { %377 = vmatpush1.bf16.msra.mxu1 %v713_v9  ;;  %v734_v23 = vld [vmem:[#allocation4 + $0x80] ss:$8 sps:$4 sm:$0xff]   ;;  %v735_v24 = vld [vmem:[#allocation4 + $0x94] ss:$8 sps:$4 sm:$0xff]   ;;  %v737_v25 = vld [vmem:[#allocation4 + $0x90] ss:$8 sps:$4 sm:$0xff]  }
  0x3f   :  { %622 = vmatmul.mubr.msk.bf16.vlgmr.msra.gmra.mrb[0].mxu0 %vm105_vm0, %v68_v8  ;;  %378 = vmatprep.subr.bf16.mxu1 %v714_v10  ;;  %v738_v26 = vld [vmem:[#allocation4 + $0xa4] ss:$8 sps:$4 sm:$0xff]   ;;  %v740_v27 = vld [vmem:[#allocation4 + $0xa0] ss:$8 sps:$4 sm:$0xff]   ;;  %v741_v28 = vld [vmem:[#allocation4 + $0xb4] ss:$8 sps:$4 sm:$0xff]  }
  0x40   :  { %v743_v29 = vld [vmem:[#allocation4 + $0xb0] ss:$8 sps:$4 sm:$0xff]   ;;  %v744_v30 = vld [vmem:[#allocation4 + $0xc4] ss:$8 sps:$4 sm:$0xff]   ;;  %v746_v31 = vld [vmem:[#allocation4 + $0xc0] ss:$8 sps:$4 sm:$0xff]  }
  0x41   :  { %v747_v32 = vld [vmem:[#allocation4 + $0xd4] ss:$8 sps:$4 sm:$0xff]   ;;  %v749_v33 = vld [vmem:[#allocation4 + $0xd0] ss:$8 sps:$4 sm:$0xff]   ;;  %v750_v34 = vld [vmem:[#allocation4 + $0xe4] ss:$8 sps:$4 sm:$0xff]  }
  0x42   :  { %379 = vmatpush1.bf16.msra.mxu1 %v716_v11  ;;  %v752_v35 = vld [vmem:[#allocation4 + $0xe0] ss:$8 sps:$4 sm:$0xff]   ;;  %v753_v36 = vld [vmem:[#allocation4 + $0xf4] ss:$8 sps:$4 sm:$0xff]   ;;  %v755_v37 = vld [vmem:[#allocation4 + $0xf0] ss:$8 sps:$4 sm:$0xff]  }
  0x43   :  { %380 = vmatprep.subr.bf16.mxu1 %v717_v12  ;;  %v944_v39 = vshrl.u32 %v75_v38, 7  ;;  %v73_v41 = vld [vmem:[%s970_s2] sm:$0x3]  ;;  %v758_v9 = vld [vmem:[#allocation6 + $0x48] sm:$0xff]   ;;  %v760_v11 = vld [vmem:[#allocation6 + $0x50] sm:$0xff]  }
  0x44   :  { %v756_v7 = vld [vmem:[#allocation6 + $0x40] sm:$0xff]   ;;  %v759_v10 = vld [vmem:[#allocation6 + $0x8] sm:$0xff]   ;;  %v761_v12 = vld [vmem:[#allocation6 + $0x10] sm:$0xff]  }
  0x45   :  { %v77_v40 = vsub.s32 0, %v944_v39  ;;  %v81_v42 = vsub.s32 1, %v944_v39  ;;  %v757_v8 = vld [vmem:[#allocation6] sm:$0xff]   ;;  %672 = vmatprep.subr.bf16.mxu0 %v756_v7 }
  0x46   :  { %381 = vmatpush1.bf16.msra.mxu1 %v719_v13  ;;  %673 = vmatpush3.bf16.msra.mxu0 %v757_v8  ;;  %v762_v13 = vld [vmem:[#allocation6 + $0x58] sm:$0xff]  }
  0x47   :  { %382 = vmatprep.subr.bf16.mxu1 %v720_v14  ;;  %v78_v43 = vrot.slane %v73_v41, %v77_v40  ;;  %v82_v44 = vrot.slane %v73_v41, %v81_v42  ;;  %674 = vmatprep.subr.bf16.mxu0 %v758_v9  ;;  %v763_v14 = vld [vmem:[#allocation6 + $0x18] sm:$0xff]  }
  0x4a   :  { %383 = vmatpush1.bf16.msra.mxu1 %v722_v15  ;;  %675 = vmatpush3.bf16.msra.mxu0 %v759_v10  ;;  %v764_v15 = vld [vmem:[#allocation6 + $0x60] sm:$0xff]  }
  0x4b   :  { %384 = vmatprep.subr.bf16.mxu1 %v723_v16  ;;  %676 = vmatprep.subr.bf16.mxu0 %v760_v11  ;;  %v765_v16 = vld [vmem:[#allocation6 + $0x20] sm:$0xff]  }
  0x4e   :  { %385 = vmatpush1.bf16.msra.mxu1 %v725_v17  ;;  %677 = vmatpush3.bf16.msra.mxu0 %v761_v12  ;;  %v766_v17 = vld [vmem:[#allocation6 + $0x68] sm:$0xff]  }
  0x4f   :  { %386 = vmatprep.subr.bf16.mxu1 %v726_v18  ;;  %678 = vmatprep.subr.bf16.mxu0 %v762_v13  ;;  %v767_v18 = vld [vmem:[#allocation6 + $0x28] sm:$0xff]  }
  0x52   :  { %387 = vmatpush1.bf16.msra.mxu1 %v728_v19  ;;  %679 = vmatpush3.bf16.msra.mxu0 %v763_v14  ;;  %v768_v19 = vld [vmem:[#allocation6 + $0x70] sm:$0xff]  }
  0x53   :  { %388 = vmatprep.subr.bf16.mxu1 %v729_v20  ;;  %680 = vmatprep.subr.bf16.mxu0 %v764_v15  ;;  %v769_v20 = vld [vmem:[#allocation6 + $0x30] sm:$0xff]  }
  0x56   :  { %389 = vmatpush1.bf16.msra.mxu1 %v731_v21  ;;  %681 = vmatpush3.bf16.msra.mxu0 %v765_v16  ;;  %v770_v21 = vld [vmem:[#allocation6 + $0x78] sm:$0xff]  }
  0x57   :  { %390 = vmatprep.subr.bf16.mxu1 %v732_v22  ;;  %682 = vmatprep.subr.bf16.mxu0 %v766_v17  ;;  %v771_v22 = vld [vmem:[#allocation6 + $0x38] sm:$0xff]  }
  0x5a   :  { %391 = vmatpush1.bf16.msra.mxu1 %v734_v23  ;;  %683 = vmatpush3.bf16.msra.mxu0 %v767_v18  ;;  %v202_v23 = vld [vmem:[%s972_s4] sm:$0x3] }
  0x5b   :  { %392 = vmatprep.subr.bf16.mxu1 %v735_v24  ;;  %684 = vmatprep.subr.bf16.mxu0 %v768_v19  ;;  %v207_v24 = vrot.slane %v202_v23, %v77_v40 }
  0x5e   :  { %393 = vmatpush1.bf16.msra.mxu1 %v737_v25  ;;  %685 = vmatpush3.bf16.msra.mxu0 %v769_v20  ;;  %v211_v25 = vrot.slane %v202_v23, %v81_v42 }
  0x5f   :  { %394 = vmatprep.subr.bf16.mxu1 %v738_v26  ;;  %686 = vmatprep.subr.bf16.mxu0 %v770_v21 }
  0x62   :  { %395 = vmatpush1.bf16.msra.mxu1 %v740_v27  ;;  %687 = vmatpush3.bf16.msra.mxu0 %v771_v22 }
  0x63   :  { %396 = vmatprep.subr.bf16.mxu1 %v741_v28 }
  0x66   :  { %397 = vmatpush1.bf16.msra.mxu1 %v743_v29 }
  0x67   :  { %398 = vmatprep.subr.bf16.mxu1 %v744_v30 }
  0x6a   :  { %399 = vmatpush1.bf16.msra.mxu1 %v746_v31 }
  0x6b   :  { %400 = vmatprep.subr.bf16.mxu1 %v747_v32 }
  0x6e   :  { %401 = vmatpush1.bf16.msra.mxu1 %v749_v33 }
  0x6f   :  { %402 = vmatprep.subr.bf16.mxu1 %v750_v34 }
  0x72   :  { %403 = vmatpush1.bf16.msra.mxu1 %v752_v35 }
  0x73   :  { %404 = vmatprep.subr.bf16.mxu1 %v753_v36 }
  0x76   :  { %405 = vmatpush1.bf16.msra.mxu1 %v755_v37 }
 0x112   :  { %v143_v45 = vpop.f32.mrb[0].mxu0 }
 0x113   :  { %v144_v46 = vadd.f32 %v143_v45, %v78_v43  ;;  %v145_v47 = vpop.f32.mrb[1].mxu0 }
 0x114   :  { %v146_v48 = vadd.f32 %v145_v47, %v82_v44  ;;  %v147_v49 = vpop.f32.mrb[2].mxu0 }
 0x115   :  { %v150_v50 = vmul.f32 %v144_v46, %v144_v46  ;;  %v148_v51 = vpop.f32.mrb[3].mxu0 }
 0x116   :  { %v151_v52 = vmul.f32 %v146_v48, %v146_v48 }
 0x117   :  { %v152_v53 = vmul.f32 %v150_v50, %v144_v46 }
 0x118   :  { %v153_v54 = vmul.f32 %v151_v52, %v146_v48 }
 0x119   :  { %v154_v55 = vmul.f32 0.044715, %v152_v53  ;;  %v655_v53 = vld [vmem:[%s974_s6] ss:$0 sm:$0xff] }
 0x11a   :  { %v155_v56 = vmul.f32 0.044715, %v153_v54 }
 0x11b   :  { %v156_v57 = vadd.f32 %v154_v55, %v144_v46 }
 0x11c   :  { %v157_v58 = vadd.f32 %v155_v56, %v146_v48 }
 0x11d   :  { %v158_v59 = vmul.f32 0.7978846, %v156_v57 }
 0x11e   :  { %v159_v60 = vmul.f32 0.7978846, %v157_v58 }
 0x11f   :  { %772 = vtanh.f32 %v158_v59 }
 0x120   :  { %774 = vtanh.f32 %v159_v60 }
 0x129   :  { %v773_v61 = vpop.eup %772 }
 0x12a   :  { %v775_v62 = vpop.eup %774  ;;  %v162_v63 = vadd.f32 1.0, %v773_v61 }
 0x12b   :  { %v163_v0 = vadd.f32 1.0, %v775_v62 }
 0x12c   :  { %v164_v1 = vmul.f32 0.5, %v162_v63 }
 0x12d   :  { %v165_v2 = vmul.f32 0.5, %v163_v0 }
 0x12e   :  { %v166_v3 = vmul.f32 %v164_v1, %v144_v46 }
 0x12f   :  { %v167_v4 = vmul.f32 %v165_v2, %v146_v48 }
 0x130   :  { %v168_v6 = vpack.c.bf16 %v166_v3, %v166_v3 }
 0x131   :  { %v169_v5 = vpack.c.bf16 %v167_v4, %v167_v4 }
 0x133   :  { %406 = vmatprep.mubr.bf16.mxu1 %v169_v5 }
 0x134   :  { %407 = vmatmul.mubr.bf16.vlgmr.msra.gmra.mrb[0].mxu1 %v168_v6 }
 0x207   :  { %v408_v26 = vpop.f32.mrb[0].mxu1 }
 0x208   :  { %v409_v27 = vadd.f32 %v408_v26, %v207_v24  ;;  %v410_v28 = vpop.f32.mrb[1].mxu1 }
 0x209   :  { %v411_v29 = vadd.f32 %v410_v28, %v211_v25  ;;  %v412_v30 = vpop.f32.mrb[2].mxu1 }
 0x20a   :  { %v415_v31 = vmul.f32 %v409_v27, %v409_v27  ;;  %v413_v32 = vpop.f32.mrb[3].mxu1 }
 0x20b   :  { %v416_v33 = vmul.f32 %v411_v29, %v411_v29 }
 0x20c   :  { %v417_v34 = vmul.f32 %v415_v31, %v409_v27 }
 0x20d   :  { %v418_v35 = vmul.f32 %v416_v33, %v411_v29 }
 0x20e   :  { %v419_v36 = vmul.f32 0.044715, %v417_v34 }
 0x20f   :  { %v420_v37 = vmul.f32 0.044715, %v418_v35 }
 0x210   :  { %v421_v38 = vadd.f32 %v419_v36, %v409_v27 }
 0x211   :  { %v422_v41 = vadd.f32 %v420_v37, %v411_v29 }
 0x212   :  { %v423_v43 = vmul.f32 0.7978846, %v421_v38 }
 0x213   :  { %v424_v44 = vmul.f32 0.7978846, %v422_v41 }
 0x214   :  { %776 = vtanh.f32 %v423_v43 }
 0x215   :  { %778 = vtanh.f32 %v424_v44 }
 0x21e   :  { %v777_v39 = vpop.eup %776 }
 0x21f   :  { %v779_v40 = vpop.eup %778  ;;  %v427_v42 = vadd.f32 1.0, %v777_v39 }
 0x220   :  { %v428_v45 = vadd.f32 1.0, %v779_v40 }
 0x221   :  { %v429_v46 = vmul.f32 0.5, %v427_v42 }
 0x222   :  { %v430_v47 = vmul.f32 0.5, %v428_v45 }
 0x223   :  { %v431_v48 = vmul.f32 %v429_v46, %v409_v27 }
 0x224   :  { %v432_v49 = vmul.f32 %v430_v47, %v411_v29 }
 0x225   :  { %v433_v51 = vpack.c.bf16 %v431_v48, %v431_v48 }
 0x226   :  { %v434_v50 = vpack.c.bf16 %v432_v49, %v432_v49 }
 0x228   :  { %602 = vmatprep.mubr.bf16.mxu0 %v434_v50 }
 0x229   :  { %603 = vmatmul.mubr.bf16.vlgmr.msra.gmra.mrb[4].mxu0 %v433_v51 }
 0x2fc   :  { %v688_v52 = vpop.f32.mrb[4].mxu0 }
 0x2fd   :  { %v689_v54 = vpop.f32.mrb[5].mxu0 }
 0x2fe   :  { %v690_v55 = vadd.f32 %v689_v54, %v688_v52  ;;  %v691_v56 = vpop.f32.mrb[6].mxu0 }
 0x2ff   :  { %v692_v57 = vpop.f32.mrb[7].mxu0 }
 0x300   :  { %v605_v58 = vadd.f32 %v690_v55, %v655_v53 }
 0x302   :  { %v610_v59 = vpack.c.bf16 %v605_v58, %v605_v58 }
 0x304   :  { %611 = vst [vmem:[%s975_s7] sm:$0xf] %v610_v59 }
 0x305   :  { %616 = vsyncpa [#allocation3], 1 }
 0x306   :  { %617 = vsyncpa [#allocation5], 1 }

</bundles_post_ra>
